<compile_context>
chip_gen: v5e
topology: v5e:2x2
jax: 0.10.0
libtpu: 0.0.40
codegen_flags: <defaults>
</compile_context>

<pallas_src>
import math

import jax
import jax.numpy as jnp
from jax import lax
from jax.experimental import pallas as pl
from jax.experimental.pallas import tpu as pltpu


def _round_up(a, b):
    return ((a + b - 1) // b) * b


def _make_conv_kernel(K, pad, W, TN, C, slope, compute_dtype):
    def kernel(x_ref, w_ref, b_ref, o_ref):
        # x_ref : (C, TN)    time-major columns; every tile holds whole windows
        # w_ref : (C, K*C)   fused per-tap weights (tap-major contraction)
        # b_ref : (C, 1)     bias
        # o_ref : (C, TN)
        x = x_ref[...]

        # Static position of each column inside its length-W window (tiles are
        # window-aligned, so this is identical for every grid step).
        pos = lax.broadcasted_iota(jnp.int32, (1, TN), 1) % W

        taps = []
        for k in range(K):                           # K is small & static
            s = k - pad                              # tap k reads column n + s
            if s == 0:
                t = x
            else:
                # Lane roll (XLU slot).  Wrapped lanes are window-boundary
                # lanes and are zeroed by the static mask below, so windows
                # (= batch entries) never bleed into each other.
                t = pltpu.roll(x, shift=(-s) % TN, axis=1)
                if s < 0:
                    t = jnp.where(pos >= -s, t, 0.0)
                else:
                    t = jnp.where(pos < W - s, t, 0.0)
            taps.append(t)
        lhs = jnp.concatenate(taps, axis=0)          # (K*C, TN), lane-dense

        w = w_ref[...]
        if compute_dtype is not None:                # bf16 MXU operands only
            lhs = lhs.astype(compute_dtype)
            w = w.astype(compute_dtype)

        out = jnp.dot(w, lhs, preferred_element_type=jnp.float32)   # (C, TN)
        out = out + b_ref[...].astype(jnp.float32)
        if slope != 1.0:                             # statically elided (slope == 1)
            out = jnp.where(out >= 0, out, slope * out)
        o_ref[...] = out.astype(o_ref.dtype)

    return kernel


def conv_layer_forward(x, weight, bias, kernel_size=3, negative_slope=1.0,
                       compute_dtype=None):
    """x: (B, W, C). weight: (C_out, C_in, K) PyTorch Conv1d layout. bias: (C_out,)."""
    B, W, C = x.shape
    K = kernel_size
    # TODO(synk): even kernel_size changes the module's output length (W-1); unsupported.
    assert K % 2 == 1, "ConvLayer Pallas kernel supports odd kernel_size only"
    pad = (K - 1) // 2
    M = B * W

    # ---- generation-aware VMEM budget -------------------------------------
    try:
        vmem_cap = int(pltpu.get_tpu_info().vmem_capacity_bytes)
    except Exception:                                 # pragma: no cover
        vmem_cap = 64 * 1024 * 1024                   # v7x-conservative fallback
    vmem_limit = max(32 * 1024 * 1024,
                     min(vmem_cap - 8 * 1024 * 1024, 100 * 1024 * 1024))
    tile_budget = vmem_limit // 2                     # headroom for compiler scratch

    # Live VMEM per lane-column: double-buffered x & out streams (2+2), K rolled
    # taps, the (K*C, TN) lhs (~K), the f32 matmul result and misc — all with
    # the channel (sublane) axis padded to 8 rows.
    c_pad = _round_up(max(C, 1), 8)
    bytes_per_col = 4 * c_pad * (2 * K + 6)
    tn_cap = max(128, tile_budget // bytes_per_col)

    # Tiles hold whole windows and a multiple of 128 lanes; aim for >= 8 grid
    # steps when there is enough work (pipelining + both v7x TensorCores).
    unit = (W * 128) // math.gcd(W, 128)              # lcm(W, 128)
    tn_budget = unit if unit > tn_cap else (tn_cap // unit) * unit
    min_tiles = 8
    tn_split = _round_up(pl.cdiv(M, min_tiles), unit)
    TN = min(tn_budget, max(unit, tn_split))

    if M <= TN:                                       # whole problem in one tile:
        TN = M                                        # full-dim block, no alignment pad
        num_tiles, Mp = 1, M
    else:
        num_tiles = pl.cdiv(M, TN)
        Mp = num_tiles * TN

    # Fused weights for out^T = w_fused @ lhs:
    #   w_fused[c_out, k*C + c_in] = weight[c_out, c_in, k]
    w_fused = jnp.transpose(weight, (0, 2, 1)).reshape(C, K * C)
    if compute_dtype is not None:
        w_fused = w_fused.astype(compute_dtype)
    b2 = bias.reshape(C, 1)

    # Time-major (lane-dense) input layout: one XLA transpose in the wrapper.
    x_t = jnp.transpose(x.reshape(M, C))              # (C, M)
    if Mp != M:                                       # ragged tail only (whole zero windows)
        x_t = jnp.pad(x_t, ((0, 0), (0, Mp - M)))

    kernel = _make_conv_kernel(K, pad, W, TN, C, float(negative_slope), compute_dtype)

    out_t = pl.pallas_call(
        kernel,
        out_shape=jax.ShapeDtypeStruct((C, Mp), x.dtype),
        grid_spec=pltpu.PrefetchScalarGridSpec(
            num_scalar_prefetch=0,
            grid=(num_tiles,),
            in_specs=[
                pl.BlockSpec((C, TN), lambda t: (0, t)),       # lane tile of x^T
                pl.BlockSpec((C, K * C), lambda t: (0, 0)),    # fused weights (shared)
                pl.BlockSpec((C, 1), lambda t: (0, 0)),        # bias (shared)
            ],
            out_specs=pl.BlockSpec((C, TN), lambda t: (0, t)),
        ),
        compiler_params=pltpu.CompilerParams(
            dimension_semantics=("parallel",),
            vmem_limit_bytes=int(vmem_limit),
        ),
    )(x_t, w_fused, b2)

    if Mp != M:
        out_t = out_t[:, :M]
    return jnp.transpose(out_t).reshape(B, W, C)


def conv_layer_reference(x, weight, bias, kernel_size=3, negative_slope=1.0):
    """Pure-JAX reference mirroring the PyTorch module."""
    pad = (kernel_size - 1) // 2
    x_pad = jnp.pad(x, ((0, 0), (pad, pad), (0, 0)))
    W = x.shape[1]
    w_k = jnp.transpose(weight, (2, 1, 0))            # (K, C_in, C_out)
    out = jnp.zeros(x.shape, jnp.float32)
    for k in range(kernel_size):
        out = out + jnp.einsum("bwc,cd->bwd", x_pad[:, k:k + W, :], w_k[k])
    out = out + bias[None, None, :]
    return jnp.where(out >= 0, out, negative_slope * out)


if __name__ == "__main__":
    key = jax.random.PRNGKey(0)
    B, W, C = 2, 16, 8          # batch, window_size, n_features
    K = 3                       # kernel_size

    kx, kw, kb = jax.random.split(key, 3)
    x = jax.random.normal(kx, (B, W, C), dtype=jnp.float32)

    # Deterministic parameter init (PyTorch Conv1d default: U(-s, s), s = 1/sqrt(C_in*K))
    s = 1.0 / (C * K) ** 0.5
    weight = jax.random.uniform(kw, (C, C, K), minval=-s, maxval=s, dtype=jnp.float32)
    bias = jax.random.uniform(kb, (C,), minval=-s, maxval=s, dtype=jnp.float32)

    out = conv_layer_forward(x, weight, bias, kernel_size=K)
    out = jax.block_until_ready(out)

    ref = conv_layer_reference(x, weight, bias, kernel_size=K)
    assert out.shape == (B, W, C)
    assert jnp.allclose(out, ref, atol=1e-4, rtol=1e-4), "mismatch vs reference"

    print("KERNEL_OK")
</pallas_src>

<mosaic_0001>
module attributes {stable_mosaic.version = 11 : i64} {
  func.func @kernel(%arg0: i32, %arg1: memref<8x32xf32, #tpu.memory_space<vmem>>, %arg2: memref<8x24xf32, #tpu.memory_space<vmem>>, %arg3: memref<8x1xf32, #tpu.memory_space<vmem>>, %arg4: memref<8x32xf32, #tpu.memory_space<vmem>>) attributes {dimension_semantics = [#tpu.dimension_semantics<parallel>], iteration_bounds = array<i64: 1>, scalar_prefetch = 0 : i64, scratch_operands = 0 : i64, tpu.core_type = #tpu.core_type<tc>, window_params = [{transform_indices = @transform_0, window_bounds = array<i64: 8, 32>}, {pipeline_mode = #tpu.pipeline_mode<synchronous>, transform_indices = @transform_1, window_bounds = array<i64: 8, 24>}, {pipeline_mode = #tpu.pipeline_mode<synchronous>, transform_indices = @transform_2, window_bounds = array<i64: 8, 1>}, {transform_indices = @transform_3, window_bounds = array<i64: 8, 32>}]} {
    %c0 = arith.constant 0 : index
    %c0_0 = arith.constant 0 : index
    %0 = vector.load %arg1[%c0, %c0_0] : memref<8x32xf32, #tpu.memory_space<vmem>>, vector<8x32xf32>
    %1 = tpu.iota {dimensions = array<i32: 1>} : vector<1x32xi32>
    %c16_i32 = arith.constant 16 : i32
    %c0_i32 = arith.constant 0 : i32
    %2 = arith.cmpi eq, %c16_i32, %c0_i32 : i32
    %c1_i32 = arith.constant 1 : i32
    %3 = arith.select %2, %c1_i32, %c16_i32 : i32
    %4 = vector.broadcast %3 : i32 to vector<1x32xi32>
    %5 = arith.remsi %1, %4 : vector<1x32xi32>
    %c0_i32_1 = arith.constant 0 : i32
    %6 = vector.broadcast %c0_i32_1 : i32 to vector<1x32xi32>
    %7 = arith.cmpi ne, %5, %6 : vector<1x32xi32>
    %c0_i32_2 = arith.constant 0 : i32
    %8 = vector.broadcast %c0_i32_2 : i32 to vector<1x32xi32>
    %9 = arith.cmpi slt, %5, %8 : vector<1x32xi32>
    %c0_i32_3 = arith.constant 0 : i32
    %10 = arith.cmpi slt, %3, %c0_i32_3 : i32
    %11 = vector.broadcast %10 : i1 to vector<1x32xi1>
    %12 = vector.broadcast %11 : vector<1x32xi1> to vector<1x32xi1>
    %13 = arith.xori %9, %12 : vector<1x32xi1>
    %14 = arith.andi %13, %7 : vector<1x32xi1>
    %15 = vector.broadcast %3 : i32 to vector<1x32xi32>
    %16 = arith.addi %5, %15 : vector<1x32xi32>
    %17 = arith.select %14, %16, %5 : vector<1x32xi1>, vector<1x32xi32>
    %c1_i32_4 = arith.constant 1 : i32
    %18 = tpu.dynamic_rotate %0 by %c1_i32_4 dim 1 : vector<8x32xf32>, i32 -> vector<8x32xf32>
    %c1_i32_5 = arith.constant 1 : i32
    %19 = vector.broadcast %c1_i32_5 : i32 to vector<1x32xi32>
    %20 = arith.cmpi sge, %17, %19 : vector<1x32xi32>
    %cst = arith.constant 0.000000e+00 : f32
    %21 = vector.shape_cast %20 : vector<1x32xi1> to vector<1x32xi1>
    %22 = vector.broadcast %21 : vector<1x32xi1> to vector<8x32xi1>
    %23 = vector.broadcast %cst : f32 to vector<8x32xf32>
    %24 = arith.select %22, %18, %23 : vector<8x32xi1>, vector<8x32xf32>
    %c31_i32 = arith.constant 31 : i32
    %25 = tpu.dynamic_rotate %0 by %c31_i32 dim 1 : vector<8x32xf32>, i32 -> vector<8x32xf32>
    %c15_i32 = arith.constant 15 : i32
    %26 = vector.broadcast %c15_i32 : i32 to vector<1x32xi32>
    %27 = arith.cmpi slt, %17, %26 : vector<1x32xi32>
    %cst_6 = arith.constant 0.000000e+00 : f32
    %28 = vector.shape_cast %27 : vector<1x32xi1> to vector<1x32xi1>
    %29 = vector.broadcast %28 : vector<1x32xi1> to vector<8x32xi1>
    %30 = vector.broadcast %cst_6 : f32 to vector<8x32xf32>
    %31 = arith.select %29, %25, %30 : vector<8x32xi1>, vector<8x32xf32>
    %32 = tpu.concatenate %24, %0, %31 in 0 : vector<8x32xf32>, vector<8x32xf32>, vector<8x32xf32> -> vector<24x32xf32>
    %c0_7 = arith.constant 0 : index
    %c0_8 = arith.constant 0 : index
    %33 = vector.load %arg2[%c0_7, %c0_8] : memref<8x24xf32, #tpu.memory_space<vmem>>, vector<8x24xf32>
    %cst_9 = arith.constant dense<0.000000e+00> : vector<8x32xf32>
    %34 = tpu.matmul %33, %32, %cst_9 {dimension_numbers = #tpu.dot_dimension_numbers<[1], [0], [0], [1], [0, 0, 1, 1], [], []>} : vector<8x24xf32>, vector<24x32xf32>, vector<8x32xf32> -> vector<8x32xf32>
    %c0_10 = arith.constant 0 : index
    %c0_11 = arith.constant 0 : index
    %35 = vector.load %arg3[%c0_10, %c0_11] : memref<8x1xf32, #tpu.memory_space<vmem>>, vector<8x1xf32>
    %36 = vector.broadcast %35 : vector<8x1xf32> to vector<8x32xf32>
    %37 = arith.addf %34, %36 : vector<8x32xf32>
    %c0_12 = arith.constant 0 : index
    %c0_13 = arith.constant 0 : index
    %38 = vector.load %arg4[%c0_12, %c0_13] : memref<8x32xf32, #tpu.memory_space<vmem>>, vector<8x32xf32>
    tpu.vector_store %arg4[%c0_12, %c0_13], %37 {strides = array<i32>} : memref<8x32xf32, #tpu.memory_space<vmem>>, vector<8x32xf32>,
    return
  }
  func.func @transform_0(%arg0: i32) -> (i32, i32) {
    %c0_i32 = arith.constant 0 : i32
    %c0_i32_0 = arith.constant 0 : i32
    return %c0_i32, %arg0 : i32, i32
  }
  func.func @transform_1(%arg0: i32) -> (i32, i32) {
    %c0_i32 = arith.constant 0 : i32
    %c0_i32_0 = arith.constant 0 : i32
    %c0_i32_1 = arith.constant 0 : i32
    return %c0_i32, %c0_i32_0 : i32, i32
  }
  func.func @transform_2(%arg0: i32) -> (i32, i32) {
    %c0_i32 = arith.constant 0 : i32
    %c0_i32_0 = arith.constant 0 : i32
    %c0_i32_1 = arith.constant 0 : i32
    return %c0_i32, %c0_i32_0 : i32, i32
  }
  func.func @transform_3(%arg0: i32) -> (i32, i32) {
    %c0_i32 = arith.constant 0 : i32
    %c0_i32_0 = arith.constant 0 : i32
    return %c0_i32, %arg0 : i32, i32
  }
}

</mosaic_0001>

<bundles_post_ra>
// kernel: tpu_custom_call.1
= control target key start
LH: loop header
LB: loop body
LE: loop exit
PB: predicated region body
PF: predicated region fallthrough
CT: control target
= control target key end

     0   :  { %8 = vsyncpa [#allocation3], 0  ;;  %s217_s0 = inlined_call_operand.vmem [shape: f32[8,32], index: 0, kind: input, shape index: {}]   ;;  %s218_s1 = inlined_call_operand.hbm [shape: f32[8,24], index: 1, kind: input, shape index: {}]   ;;  %s219_s2 = inlined_call_operand.vmem [shape: f32[8,1], index: 2, kind: input, shape index: {}]   ;;  %s220_s3 = inlined_call_operand.hbm [shape: f32[8,32], index: 3, kind: output, shape index: {}]  }
   0x1   :  { %9 = vsyncpa [#allocation4], 0  ;;  %s17_s14 = sshll.u32 %s218_s1, 4  ;;  %s179_s15 = smov [#allocation2]   ;;  %s18_s14 = int_to_ptr.hbm [resolvable:$true] %s17_s14 }
   0x2   :  { %s19_s16 = sshll.u32 %s179_s15, 4  ;;  %s20_s16 = int_to_ptr.vmem [resolvable:$true] %s19_s16 }
   0x3   :  { %22 = dma.hbm_to_vmem [thread:$0]  %s18_s14, 128, %s20_s16, [#allocation3]  }
   0x4   :  { %175 = dma.done.wait [#allocation3], 128  }
   0x5   :  { %176 = vsyncadd [#allocation3], 4294967168  ;;  %v29_v0 = vld [vmem:[%s217_s0] sm:$0xff]  ;;  %s180_s19 = smov 32   ;;  %vm44_vm0 = vcmask 1047808   ;;  %s181_s1 = smov 127   ;;  %v30_v7 = vlaneseq }
   0x6   :  { %45 = vrot.lane.b32.xlu0 %v29_v0, %s180_s19  ;;  %s182_s20 = smov 97   ;;  %v67_v5 = vld [vmem:[%s219_s2] sm:$0xff]  ;;  %v183_v6 = vmov 0   ;;  %vm73_vm3 = vcmask 195584   ;;  %s184_s0 = smov [#allocation5]   ;;  %vm97_vm4 = vcmask 261120  }
   0x7   :  { %125 = vset.pattern.permute.xlu2 %v183_v6  ;;  %126 = vset.pattern.permute.xlu0 %v183_v6  ;;  %v31_v8 = vand.u32 127, %v30_v7  ;;  %v66_v11 = vld [vmem:[#allocation2] sm:$0xff]  ;;  %s104_s2 = sshll.u32 %s184_s0, 4  ;;  %s106_s25 = sshll.u32 %s220_s3, 4  ;;  %s105_s2 = int_to_ptr.vmem [resolvable:$true] %s104_s2  ;;  %s107_s25 = int_to_ptr.hbm [resolvable:$true] %s106_s25 }
   0x8   :  { %70 = vperm.xlu2 %125, %v67_v5  }
   0x9   :  { %v36_v9 = vand.u32 15, %v31_v8 }
   0xb   :  { %vm59_vm1 = vcmp.lt.s32.totalorder %v36_v9, 15  ;;  %vm51_vm2 = vcmp.ge.s32.totalorder %v36_v9, 1 }
  0x62   :  { %v71_v13 = vpop.permute.xlu2 %70 }
  0x78   :  { %v46_v1 = vpop.permute.xlu0 %45 }
  0x79   :  { %v47_v2 = vsel %vm44_vm0, %v46_v1, %v29_v0 }
  0x7a   :  { %48 = vrot.lane.b32.xlu0 %v47_v2, %s180_s19 }
  0xec   :  { %v49_v3 = vpop.permute.xlu0 %48 }
  0xed   :  { %v50_v4 = vsel %vm44_vm0, %v49_v3, %v29_v0 }
  0xee   :  { %62 = vrot.lane.b32.xlu1 %v50_v4, %s181_s1 }
  0xf6   :  { %55 = vrot.lane.b32.xlu1 %v50_v4, %s182_s20 }
 0x160   :  { %v63_v10 = vpop.permute.xlu1 %62 }
 0x161   :  { %116 = vmatpush.msk.msra.mxu0 %vm59_vm1, %v63_v10 }
 0x163   :  { %91 = vmatpush.msra.mxu0 %v29_v0 }
 0x168   :  { %v56_v12 = vpop.permute.xlu1 %55 }
 0x169   :  { %117 = vmatpush.msk.msra.mxu0 %vm51_vm2, %v56_v12 }
 0x16a   :  { %118 = vmatmul.msk.f32.vlgmr.msra.gmra.mxu0 %vm73_vm3, %v66_v11 }
 0x1e7   :  { %v94_v14 = vpop.f32.mrf.mxu0 }
 0x1e8   :  { %v95_v15 = vadd.f32 %v94_v14, %v71_v13 }
 0x1ea   :  { %98 = vst.msk [vmem:[#allocation5] sm:$0xff] %vm97_vm4, %v95_v15 }
 0x1eb   :  { %109 = dma.vmem_to_hbm [thread:$0]  %s105_s2, 128, %s107_s25, [#allocation4]  }
 0x1ec   :  { %177 = dma.done.wait [#allocation4], 128  }
 0x1ed   :  { %178 = vsyncadd [#allocation4], 4294967168 }
 0x1ee   :  { %114 = vsyncpa [#allocation3], 1 }
 0x1ef   :  { %115 = vsyncpa [#allocation4], 1 }

</bundles_post_ra>
